<compile_context>
chip_gen: v7x
topology: tpu7x:2x2x1
jax: 0.10.0
libtpu: 0.0.40
codegen_flags: <defaults>
</compile_context>

<pallas_src>
import math
import functools

import numpy as np
import jax
import jax.numpy as jnp
from jax.experimental import pallas as pl
from jax.experimental.pallas import tpu as pltpu


# ----------------------------- shared math ---------------------------------

def _layernorm(x, w, b, eps=1e-6):
    mu = jnp.mean(x, axis=-1, keepdims=True)
    var = jnp.mean((x - mu) ** 2, axis=-1, keepdims=True)
    return (x - mu) * jax.lax.rsqrt(var + eps) * w + b


def _gelu(x):
    # PreSumm's gelu (tanh approximation)
    return 0.5 * x * (1.0 + jnp.tanh(math.sqrt(2.0 / math.pi) * (x + 0.044715 * x ** 3)))


# ------------------------------- kernels ------------------------------------

def pos_encode_kernel(x_ref, pe_ref, o_ref, *, scale):
    # PositionalEncoding.forward (step=None, add_emb=None):
    #   emb * sqrt(dim) + pe[:, :S]   (dropout == identity at inference)
    # x_ref: (TB, S, D), pe_ref: (S, D) broadcast over the folded batch rows.
    o_ref[...] = x_ref[...] * scale + pe_ref[...]


def encoder_stack_kernel(lens_ref,                       # scalar-prefetch (SMEM)
                         x_ref, pe_ref,
                         ln1w_ref, ln1b_ref,
                         wqkv_ref, bqkv_ref, wo_ref, bo_ref,
                         ln2w_ref, ln2b_ref,
                         w1_ref, b1_ref, w2_ref, b2_ref,
                         lnfw_ref, lnfb_ref,
                         o_ref, *, heads):
    f32, bf16 = jnp.float32, jnp.bfloat16
    tb, S, D = x_ref.shape
    R = tb * S
    dk = D // heads

    layer = pl.program_id(1)
    n_layers = pl.num_programs(1)

    # ---- layer 0: fused PositionalEncoding (emb*sqrt(dim) + pe; dropout==id)
    @pl.when(layer == 0)
    def _():
        o_ref[...] = x_ref[...] * math.sqrt(D) + pe_ref[...]

    # Resident activation: the output block index is constant across the L
    # grid axis, so o_ref stays in VMEM and carries the activation layer->layer.
    h = o_ref[...].reshape(R, D)                                   # (R, D) f32

    # ---- pre-LayerNorm (PreSumm applies it only when layer != 0) ----
    ln1 = _layernorm(h, ln1w_ref[0], ln1b_ref[0])
    use_ln = (layer > 0).astype(f32)                               # scalar blend
    xn = h + use_ln * (ln1 - h)
    xb = xn.astype(bf16)

    # ---- fused QKV projection: one (R, D) x (D, 3D) MXU matmul.
    # 1/sqrt(dk) is already folded into Wq / bq by the wrapper prep. ----
    qkv = jnp.dot(xb, wqkv_ref[0], preferred_element_type=f32) + bqkv_ref[0]
    wo = wo_ref[0]                                                 # (D, D) bf16

    # ---- attention with Wo folded into the head loop: every matmul result and
    # accumulation is full 128-lane width (no 32-lane ctx stores). ----
    out_rows = []
    for t in range(tb):
        length = lens_ref[pl.program_id(0) * tb + t]               # SMEM scalar
        kpos = jax.lax.broadcasted_iota(jnp.int32, (1, S), 1)
        bias = jnp.where(kpos < length, 0.0, -1e18)                # (1, S) f32
        rows = slice(t * S, (t + 1) * S)
        acc = None
        for hd in range(heads):
            c0 = hd * dk
            qh = qkv[rows, c0:c0 + dk].astype(bf16)                # (S, dk)
            kh = qkv[rows, D + c0:D + c0 + dk].astype(bf16)
            vh = qkv[rows, 2 * D + c0:2 * D + c0 + dk].astype(bf16)
            scores = jax.lax.dot_general(qh, kh, (((1,), (1,)), ((), ())),
                                         preferred_element_type=f32)  # (S, S)
            scores = scores + bias                                 # masked_fill
            p = jnp.exp(scores - jnp.max(scores, axis=-1, keepdims=True))
            attn = p * pl.reciprocal(jnp.sum(p, axis=-1, keepdims=True),
                                     approx=True)
            # (attn @ v_h) @ Wo_h  ==  attn @ (v_h @ Wo[h*dk:(h+1)*dk, :])
            vwo = jnp.dot(vh, wo[c0:c0 + dk, :],
                          preferred_element_type=f32)              # (S, D)
            part = jnp.dot(attn.astype(bf16), vwo.astype(bf16),
                           preferred_element_type=f32)             # (S, D)
            acc = part if acc is None else acc + part
        out_rows.append(acc)
    attn_acc = out_rows[0] if tb == 1 else jnp.concatenate(out_rows, axis=0)
    attn_out = attn_acc + bo_ref[0]
    res1 = attn_out + h                                            # dropout == id

    # ---- PositionwiseFeedForward: LN -> gelu(w1) -> w2 -> + residual ----
    yn = _layernorm(res1, ln2w_ref[0], ln2b_ref[0])
    inter = _gelu(jnp.dot(yn.astype(bf16), w1_ref[0],
                          preferred_element_type=f32) + b1_ref[0])
    ff = jnp.dot(inter.astype(bf16), w2_ref[0],
                 preferred_element_type=f32) + b2_ref[0]
    out = ff + res1

    o_ref[...] = out.reshape(tb, S, D)

    # ---- fused final LayerNorm on the last layer ----
    @pl.when(layer == n_layers - 1)
    def _():
        o_ref[...] = _layernorm(out, lnfw_ref[...],
                                lnfb_ref[...]).reshape(tb, S, D)


# ------------------------------- wrappers ------------------------------------

def positional_encoding(emb, pe):
    """Standalone PositionalEncoding.forward (step=None, add_emb=None).

    The `step` / `add_emb` branches are trivially handled outside the kernel
    (slice pe at `step`, add `add_emb` to the scaled embedding)."""
    B, S, D = emb.shape
    # Fold batch into rows (HBM-bandwidth bound); keep >= 2 grid blocks when
    # B >= 2 so both v7x TensorCores participate (no-op on v5e/v6e).
    tb = B if B < 2 else max(1, B // 2)
    tb = min(tb, max(1, 1024 // S))
    while B % tb:
        tb -= 1
    return pl.pallas_call(
        functools.partial(pos_encode_kernel, scale=math.sqrt(D)),
        grid=(B // tb,),
        in_specs=[pl.BlockSpec((tb, S, D), lambda b: (b, 0, 0)),
                  pl.BlockSpec((S, D), lambda b: (0, 0))],
        out_specs=pl.BlockSpec((tb, S, D), lambda b: (b, 0, 0)),
        out_shape=jax.ShapeDtypeStruct((B, S, D), emb.dtype),
        compiler_params=pltpu.CompilerParams(dimension_semantics=("parallel",)),
    )(emb, pe[:S])


def prepare_encoder_params(params, heads):
    """One-time weight prep, hoisted out of the forward pass:
    transpose to (in, out), fuse Wq|Wk|Wv -> (D, 3D), fold 1/sqrt(dk) into
    Wq / bq, cast matmul weights to bf16, and stack all layers on a leading
    L axis so a single pallas_call can index them by layer grid coordinate."""
    bf16 = jnp.bfloat16
    layers = params["layers"]
    D = layers[0]["wq"].shape[1]
    scale = 1.0 / math.sqrt(D // heads)

    def stack(fn):
        return jnp.stack([fn(lp) for lp in layers])

    return {
        "ln1_w": stack(lambda lp: lp["ln1_w"]),                     # (L, 1, D)
        "ln1_b": stack(lambda lp: lp["ln1_b"]),
        "wqkv": stack(lambda lp: jnp.concatenate(
            [lp["wq"].T * scale, lp["wk"].T, lp["wv"].T], axis=1)).astype(bf16),
        "bqkv": stack(lambda lp: jnp.concatenate(
            [lp["bq"] * scale, lp["bk"], lp["bv"]], axis=1)),       # (L, 1, 3D)
        "wo": stack(lambda lp: lp["wo"].T).astype(bf16),            # (L, D, D)
        "bo": stack(lambda lp: lp["bo"]),
        "ln2_w": stack(lambda lp: lp["ln2_w"]),
        "ln2_b": stack(lambda lp: lp["ln2_b"]),
        "w1": stack(lambda lp: lp["w1"].T).astype(bf16),            # (L, D, dff)
        "b1": stack(lambda lp: lp["b1"]),
        "w2": stack(lambda lp: lp["w2"].T).astype(bf16),            # (L, dff, D)
        "b2": stack(lambda lp: lp["b2"]),
        "lnf_w": params["lnf_w"],
        "lnf_b": params["lnf_b"],
    }


def transformer_encoder(top_vecs, mask, prep, pe, heads):
    B, S, D = top_vecs.shape
    L = prep["wqkv"].shape[0]
    d_ff = prep["w1"].shape[-1]

    # Per-sequence valid lengths live in SMEM via scalar prefetch; the additive
    # mask is rebuilt in-kernel with broadcasted_iota (no 16-lane f32 bias DMA).
    # TODO(synk): assumes contiguous right-padding masks (true for PreSumm).
    lens = jnp.sum(jnp.logical_not(mask), axis=-1).astype(jnp.int32)

    # Fold batch sequences into the matmul M dimension, but keep >= 2 blocks
    # along the "parallel" grid axis so both v7x TensorCores get work.
    tb = B if B < 2 else max(1, B // 2)
    tb = min(tb, max(1, 2048 // S))
    while B % tb:
        tb -= 1
    num_b_blocks = B // tb

    def rep(shape):
        nd = len(shape)
        return pl.BlockSpec(tuple(shape), lambda b, l, lens_ref: (0,) * nd)

    def per_layer(trailing):
        nd = len(trailing)
        return pl.BlockSpec((1,) + tuple(trailing),
                            lambda b, l, lens_ref: (l,) + (0,) * nd)

    in_specs = [
        pl.BlockSpec((tb, S, D), lambda b, l, lens_ref: (b, 0, 0)),   # x
        rep((S, D)),                                                  # pe slice
        per_layer((1, D)), per_layer((1, D)),                         # ln1 w, b
        per_layer((D, 3 * D)), per_layer((1, 3 * D)),                 # wqkv, bqkv
        per_layer((D, D)), per_layer((1, D)),                         # wo, bo
        per_layer((1, D)), per_layer((1, D)),                         # ln2 w, b
        per_layer((D, d_ff)), per_layer((1, d_ff)),                   # w1, b1
        per_layer((d_ff, D)), per_layer((1, D)),                      # w2, b2
        rep((1, D)), rep((1, D)),                                     # final ln
    ]

    # VMEM budget re-derived from need (review: 48 MiB was 3/4 of v7x's 64 MiB
    # physical VMEM): one layer's bf16 weights double-buffered + activation /
    # pe blocks + headroom, floored at 12 MiB and capped at 30 MiB.
    w_bytes = (D * 3 * D + D * D + 2 * D * d_ff) * 2 + (11 * D + d_ff) * 4
    act_bytes = tb * S * D * 4
    vmem_limit = int(min(max(2 * w_bytes + 8 * act_bytes + (6 << 20), 12 << 20),
                         30 << 20))

    grid_spec = pltpu.PrefetchScalarGridSpec(
        num_scalar_prefetch=1,
        grid=(num_b_blocks, L),
        in_specs=in_specs,
        out_specs=pl.BlockSpec((tb, S, D), lambda b, l, lens_ref: (b, 0, 0)),
    )
    return pl.pallas_call(
        functools.partial(encoder_stack_kernel, heads=heads),
        grid_spec=grid_spec,
        out_shape=jax.ShapeDtypeStruct((B, S, D), jnp.float32),
        compiler_params=pltpu.CompilerParams(
            dimension_semantics=("parallel", "arbitrary"),
            vmem_limit_bytes=vmem_limit),
    )(lens, top_vecs, pe[:S],
      prep["ln1_w"], prep["ln1_b"],
      prep["wqkv"], prep["bqkv"], prep["wo"], prep["bo"],
      prep["ln2_w"], prep["ln2_b"],
      prep["w1"], prep["b1"], prep["w2"], prep["b2"],
      prep["lnf_w"], prep["lnf_b"])


# ------------------------- params / positional table -------------------------

def make_pe(max_len, dim):
    position = jnp.arange(max_len, dtype=jnp.float32)[:, None]
    div_term = jnp.exp(jnp.arange(0, dim, 2, dtype=jnp.float32) * -(math.log(10000.0) / dim))
    pe = jnp.zeros((max_len, dim), jnp.float32)
    pe = pe.at[:, 0::2].set(jnp.sin(position * div_term))
    pe = pe.at[:, 1::2].set(jnp.cos(position * div_term))
    return pe


def init_params(key, d_model, d_ff, num_layers):
    keys = iter(jax.random.split(key, num_layers * 20 + 4))

    def dense(out_dim, in_dim):
        return 0.02 * jax.random.normal(next(keys), (out_dim, in_dim), jnp.float32)

    def vec(dim, scale=0.02):
        return scale * jax.random.normal(next(keys), (1, dim), jnp.float32)

    layers = []
    for _ in range(num_layers):
        layers.append({
            "ln1_w": 1.0 + vec(d_model, 0.01), "ln1_b": vec(d_model, 0.01),
            "wq": dense(d_model, d_model), "bq": vec(d_model),
            "wk": dense(d_model, d_model), "bk": vec(d_model),
            "wv": dense(d_model, d_model), "bv": vec(d_model),
            "wo": dense(d_model, d_model), "bo": vec(d_model),
            "ln2_w": 1.0 + vec(d_model, 0.01), "ln2_b": vec(d_model, 0.01),
            "w1": dense(d_ff, d_model), "b1": vec(d_ff),
            "w2": dense(d_model, d_ff), "b2": vec(d_model),
        })
    return {"layers": layers,
            "lnf_w": 1.0 + vec(d_model, 0.01),
            "lnf_b": vec(d_model, 0.01)}


# ----------------------------- pure-JAX reference ----------------------------
# Mirrors the kernel's bf16-operand / f32-accumulation matmuls so the
# comparison is tight; the kernel's approx softmax reciprocal, fused QKV
# rounding and per-head Wo-fold reorder are the only intentional (small)
# numerical differences, covered by the 5e-2 tolerance.

def reference_forward(x, mask, params, pe, heads):
    bf16 = jnp.bfloat16
    f32 = jnp.float32
    B, S, D = x.shape
    dk = D // heads
    scale = 1.0 / math.sqrt(dk)
    bias4 = jnp.where(mask, -1e18, 0.0).astype(f32)[:, None, None, :]

    def mm(a, w):   # a @ w.T with bf16 operands, f32 accumulation
        return jnp.einsum("bsd,de->bse", a.astype(bf16), w.T.astype(bf16),
                          preferred_element_type=f32)

    h = x * math.sqrt(D) + pe[None, :S]
    for i, lp in enumerate(params["layers"]):
        xn = _layernorm(h, lp["ln1_w"], lp["ln1_b"]) if i != 0 else h
        q = mm(xn, lp["wq"]) + lp["bq"]
        k = mm(xn, lp["wk"]) + lp["bk"]
        v = mm(xn, lp["wv"]) + lp["bv"]
        split = lambda t: t.reshape(B, S, heads, dk).transpose(0, 2, 1, 3)
        qh = (split(q) * scale).astype(bf16)
        kh = split(k).astype(bf16)
        vh = split(v).astype(bf16)
        scores = jnp.einsum("bhqd,bhkd->bhqk", qh, kh, preferred_element_type=f32)
        scores = scores + bias4
        p = jnp.exp(scores - jnp.max(scores, axis=-1, keepdims=True))
        attn = p / jnp.sum(p, axis=-1, keepdims=True)
        ctx = jnp.einsum("bhqk,bhkd->bhqd", attn.astype(bf16), vh,
                         preferred_element_type=f32)
        ctx = ctx.transpose(0, 2, 1, 3).reshape(B, S, D)
        res1 = mm(ctx, lp["wo"]) + lp["bo"] + h
        yn = _layernorm(res1, lp["ln2_w"], lp["ln2_b"])
        inter = _gelu(mm(yn, lp["w1"]) + lp["b1"])
        h = mm(inter, lp["w2"]) + lp["b2"] + res1
    return _layernorm(h, params["lnf_w"], params["lnf_b"])


# ---------------------------------- main --------------------------------------

if __name__ == "__main__":
    # Small but lane-aligned shapes: D, d_ff multiples of 128; S multiple of 8.
    B, S, D, HEADS, D_FF, NUM_LAYERS = 2, 16, 128, 4, 256, 2

    key = jax.random.PRNGKey(0)
    k_x, k_p = jax.random.split(key)

    top_vecs = jax.random.normal(k_x, (B, S, D), jnp.float32)
    lengths = jnp.array([[16], [9]])                          # valid tokens per sequence
    mask = jnp.arange(S)[None, :] >= lengths                  # True == padded / masked
    params = init_params(k_p, D, D_FF, NUM_LAYERS)
    pe = make_pe(5000, D)

    # 1) The spec module on its own: PositionalEncoding.forward (exact f32 math).
    pos_out = jax.block_until_ready(positional_encoding(top_vecs, pe))
    pos_ref = top_vecs * math.sqrt(D) + pe[None, :S]
    np.testing.assert_allclose(np.asarray(pos_out), np.asarray(pos_ref),
                               rtol=1e-5, atol=1e-5)

    # 2) Full PreSumm-style encoder: one fused pallas_call over all layers,
    #    with PositionalEncoding fused into layer 0 and final LN into layer L-1.
    prep = prepare_encoder_params(params, HEADS)   # one-time weight prep (hoisted)
    out = jax.block_until_ready(transformer_encoder(top_vecs, mask, prep, pe, HEADS))
    ref = reference_forward(top_vecs, mask, params, pe, HEADS)
    np.testing.assert_allclose(np.asarray(out), np.asarray(ref),
                               rtol=5e-2, atol=5e-2)

    print("KERNEL_OK")
</pallas_src>

<mosaic_0001>
module attributes {stable_mosaic.version = 11 : i64} {
  func.func @pos_encode_kernel(%arg0: i32, %arg1: memref<1x16x128xf32, #tpu.memory_space<vmem>>, %arg2: memref<16x128xf32, #tpu.memory_space<vmem>>, %arg3: memref<1x16x128xf32, #tpu.memory_space<vmem>>) attributes {dimension_semantics = [#tpu.dimension_semantics<parallel>], iteration_bounds = array<i64: 2>, scalar_prefetch = 0 : i64, scratch_operands = 0 : i64, tpu.core_type = #tpu.core_type<tc>, window_params = [{transform_indices = @transform_0, window_bounds = array<i64: 1, 16, 128>}, {pipeline_mode = #tpu.pipeline_mode<synchronous>, transform_indices = @transform_1, window_bounds = array<i64: 16, 128>}, {transform_indices = @transform_2, window_bounds = array<i64: 1, 16, 128>}]} {
    %c0 = arith.constant 0 : index
    %c0_0 = arith.constant 0 : index
    %c0_1 = arith.constant 0 : index
    %0 = vector.load %arg1[%c0, %c0_0, %c0_1] : memref<1x16x128xf32, #tpu.memory_space<vmem>>, vector<1x16x128xf32>
    %cst = arith.constant 11.3137083 : f32
    %1 = vector.broadcast %cst : f32 to vector<1x16x128xf32>
    %2 = arith.mulf %0, %1 : vector<1x16x128xf32>
    %c0_2 = arith.constant 0 : index
    %c0_3 = arith.constant 0 : index
    %3 = vector.load %arg2[%c0_2, %c0_3] : memref<16x128xf32, #tpu.memory_space<vmem>>, vector<16x128xf32>
    %4 = vector.shape_cast %3 : vector<16x128xf32> to vector<1x16x128xf32>
    %5 = arith.addf %2, %4 : vector<1x16x128xf32>
    %c0_4 = arith.constant 0 : index
    %c0_5 = arith.constant 0 : index
    %c0_6 = arith.constant 0 : index
    %6 = vector.load %arg3[%c0_4, %c0_5, %c0_6] : memref<1x16x128xf32, #tpu.memory_space<vmem>>, vector<1x16x128xf32>
    tpu.vector_store %arg3[%c0_4, %c0_5, %c0_6], %5 {strides = array<i32>} : memref<1x16x128xf32, #tpu.memory_space<vmem>>, vector<1x16x128xf32>,
    return
  }
  func.func @transform_0(%arg0: i32) -> (i32, i32, i32) {
    %c0_i32 = arith.constant 0 : i32
    %c0_i32_0 = arith.constant 0 : i32
    %c0_i32_1 = arith.constant 0 : i32
    return %arg0, %c0_i32, %c0_i32_0 : i32, i32, i32
  }
  func.func @transform_1(%arg0: i32) -> (i32, i32) {
    %c0_i32 = arith.constant 0 : i32
    %c0_i32_0 = arith.constant 0 : i32
    %c0_i32_1 = arith.constant 0 : i32
    return %c0_i32, %c0_i32_0 : i32, i32
  }
  func.func @transform_2(%arg0: i32) -> (i32, i32, i32) {
    %c0_i32 = arith.constant 0 : i32
    %c0_i32_0 = arith.constant 0 : i32
    %c0_i32_1 = arith.constant 0 : i32
    return %arg0, %c0_i32, %c0_i32_0 : i32, i32, i32
  }
}

</mosaic_0001>

<bundles_post_ra>
// kernel: tpu_custom_call.1
= control target key start
LH: loop header
LB: loop body
LE: loop exit
PB: predicated region body
PF: predicated region fallthrough
CT: control target
= control target key end

     0   :  { %7 = vsyncpa [#allocation3], 0  ;;  %s722_s0 = inlined_call_operand.hbm [shape: f32[2,16,128], index: 0, kind: input, shape index: {}]   ;;  %s723_s1 = inlined_call_operand.hbm [shape: f32[16,128], index: 1, kind: input, shape index: {}]   ;;  %s724_s2 = inlined_call_operand.hbm [shape: f32[2,16,128], index: 2, kind: output, shape index: {}]  }
   0x1   :  { %9 = vsyncpa [#allocation3 + $0x1], 0 }
   0x2   :  { %10 = vsyncpa [#allocation6], 0 }
   0x3   :  { %11 = vsyncpa [#allocation4], 0 }
   0x4   :  { %13 = vsyncpa [#allocation4 + $0x1], 0  ;;  %s515_s9 = smov 0   ;;  %s517_s10 = smov 0  }
   0x5   :  { %s519_s11 = smov 0   ;;  %s521_s12 = smov 0  }
   0x6 LB: > { %s536_s13 = sadd.s32 4294967295, %s491_s12   ;;  %s284_s14 = sadd.s32 4294967294, %s491_s12   ;;  %s491_s12 = sphi %s521_s12, %s744_s12   ;;  %s487_s11 = sphi %s519_s11, %s743_s11   ;;  %s483_s10 = sphi %s517_s10, %s742_s10   ;;  %s479_s9 = sphi %s515_s9, %s741_s9  }
   0x7   : > { %p39_p0 = scmp.ne.s32.totalorder %s483_s10, %s479_s9  ;;  %p725_p1 = scmp.eq.s32.totalorder %s536_s13, 0 }
   0x8   : > { %p90_p3 = scmp.eq.s32.totalorder %s284_s14, 1  ;;  %p285_p5 = scmp.ge.s32.totalorder %s491_s12, 1 }
   0x9   : > { %p545_p4 = por %p725_p1, %p39_p0  ;;  %p97_p7 = scmp.lt.s32.totalorder %s491_s12, 3 }
   0xa   : > { %p550_p6 = por %p90_p3, %p39_p0  ;;  %s493_s18 = smov [#allocation5]  }
   0xb   : > { %s728_s15 = scalar_select %p545_p4, 1, 0 }
   0xc   : > { %s729_s16 = scalar_select %p550_p6, 1, 0 }
   0xd   : > { %p555_p8 = pnand %p285_p5, %p97_p7  ;;  %s109_s19 = sshll.u32 %s493_s18, 4  ;;  %s559_s19 = int_to_ptr.vmem [resolvable:$true] %s109_s19 }
   0xe   : > { %s571_s21 = sadd.s32 1, %s491_s12   ;;  %s26_s22 = sadd.s32 1, %s487_s11 }
   0xf   : > { %s730_s17 = scalar_select %p555_p8, 1, 0 }
  0x10   : > { %p310_p9 = pneg %p555_p8  ;;  %s23_s23 = ssub.s32 %s491_s12, %s571_s21 }
  0x11   : > { %s363_s26 = scalar_lea.hbm %s723_s1, 256 }
  0x12   : > { %p566_p11 = pnand %p310_p9, %p725_p1  ;;  %p364_p12 = scmp.ne.s32.totalorder %s723_s1, %s363_s26 }
  0x13   : > { %p370_p5 = scmp.lt.u32.totalorder %s363_s26, %s723_s1 }
  0x14   : > { %p365_p13 = pneg %p566_p11 }
  0x16   : > { %p366_p0 = pnand %p365_p13, %p364_p12 }
  0x18   : > { %p367_p3 = pneg %p366_p0 }
  0x1a   : > { %p372_p7 = pnand %p370_p5, %p367_p3 }
  0x1c   : > { %375 = shalt.err (!%p372_p7)
}
  0x1d   : > { %s376_s3 = scalar_lea.vmem %s559_s19, 256  ;;  %p384_p2 = scmp.lt.s32.totalorder %s559_s19, %s559_s19 }
  0x1e   : > { %p377_p9 = scmp.ne.s32.totalorder %s559_s19, %s376_s3  ;;  %p385_p6 = scmp.lt.s32.totalorder %s376_s3, %s376_s3 }
  0x20   : > { %p379_p10 = pnand %p377_p9, %p365_p13  ;;  %p386_p4 = por %p385_p6, %p384_p2 }
  0x22   : > { %p380_p1 = pneg %p379_p10 }
  0x24   : > { %p387_p8 = pnand %p386_p4, %p380_p1 }
  0x26   : > { %390 = shalt.err (!%p387_p8)
}
  0x27   : > { %s494_s4 = smov 128   ;;  %s495_s5 = smov 8  }
  0x28   : > { %313 = dma.hbm_to_vmem [thread:$0]  (!%p566_p11), %s723_s1, 256, %s559_s19, [#allocation6], %s494_s4, %s494_s4, %s495_s5  }
  0x29   : > { %p24_p1 = scmp.eq.s32.totalorder %s23_s23, 0  ;;  %p33_p2 = scmp.ne.s32.totalorder %s487_s11, %s483_s10 }
  0x2a   : > { %p34_p4 = scmp.eq.s32.totalorder %s491_s12, 0  ;;  %p323_p6 = scmp.lt.s32.totalorder %s491_s12, 2 }
  0x2b   : > { %s605_s8 = scalar_select %p24_p1, %s487_s11, %s26_s22  }
  0x2c   : > { %p35_p8 = por %p34_p4, %p33_p2  ;;  %p732_p10 = scmp.eq.s32.totalorder %s536_s13, 1 }
  0x2d   : > { %s123_s18 = sand.u32 1, %s487_s11   ;;  %s300_s20 = sshll.u32 %s491_s12, 8 }
  0x2e   : > { %p609_p12 = por %p732_p10, %p33_p2  ;;  %s288_s24 = sshll.u32 %s123_s18, 4 }
  0x2f   : > { %s618_s27 = scalar_lea.hbm %s722_s0, %s300_s20  ;;  %s127_s19 = scalar_lea.vmem [#allocation2], %s288_s24 }
  0x30   : > { %s134_s22 = sshll.u32 %s127_s19, 4  ;;  %p620_p11 = pnand %p323_p6, %p35_p8  ;;  %s624_s22 = int_to_ptr.vmem [resolvable:$true] %s134_s22 }
  0x31   : > { %s626_s28 = scalar_lea.sflag [#allocation3], %s123_s18  ;;  %s391_s29 = scalar_lea.hbm %s618_s27, 256 }
  0x32   : > { %p392_p13 = scmp.ne.s32.totalorder %s618_s27, %s391_s29  ;;  %p393_p0 = pneg %p620_p11 }
  0x33   : > { %s396_s6 = scalar_lea.hbm %s722_s0, 512  ;;  %p397_p7 = scmp.lt.u32.totalorder %s618_s27, %s722_s0 }
  0x34   : > { %p394_p3 = pnand %p393_p0, %p392_p13  ;;  %p398_p9 = scmp.lt.u32.totalorder %s396_s6, %s391_s29 }
  0x35   : > { %p400_p2 = scmp.lt.u32.totalorder %s391_s29, %s618_s27 }
  0x36   : > { %p395_p5 = pneg %p394_p3  ;;  %p399_p1 = por %p398_p9, %p397_p7 }
  0x38   : > { %p401_p4 = por %p400_p2, %p399_p1 }
  0x3a   : > { %p402_p6 = pnand %p401_p4, %p395_p5 }
  0x3c   : > { %405 = shalt.err (!%p402_p6)
}
  0x3d   : > { %s406_s18 = scalar_lea.vmem %s624_s22, 256  ;;  %s496_s24 = smov [#allocation2]  }
  0x3e   : > { %p407_p8 = scmp.ne.s32.totalorder %s624_s22, %s406_s18  ;;  %s411_s25 = sshll.u32 %s496_s24, 4  ;;  %s412_s25 = int_to_ptr.vmem [resolvable:$false] %s411_s25 }
  0x3f   : > { %s413_s26 = scalar_lea.vmem %s412_s25, 512  ;;  %p414_p3 = scmp.lt.s32.totalorder %s624_s22, %s412_s25 }
  0x40   : > { %p409_p10 = pnand %p407_p8, %p393_p0  ;;  %p415_p7 = scmp.lt.s32.totalorder %s413_s26, %s406_s18 }
  0x42   : > { %p410_p13 = pneg %p409_p10  ;;  %p416_p9 = por %p415_p7, %p414_p3 }
  0x44   : > { %p417_p1 = pnand %p416_p9, %p410_p13 }
  0x46   : > { %420 = shalt.err (!%p417_p1)
}
  0x47   : > { %317 = dma.hbm_to_vmem [thread:$0]  (!%p620_p11), %s618_s27, 256, %s624_s22, %s626_s28, %s494_s4, %s494_s4, %s495_s5  }
  0x48   : > { %p735_p0 = scmp.ne.s32.totalorder %s730_s17, 0 }
  0x49   : > { %s660_s19 = sand.u32 (!%p735_p0), 1, %s483_s10   ;;  %p736_p5 = scmp.ne.s32.totalorder (!%p735_p0), %s728_s15, 0 }
  0x4a   : > { %146 = sbr.rel (%p735_p0) target bundleno = 111 (0x6f), region = 28  ;;  %s292_s29 = sshll.u32 (!%p735_p0), %s660_s19, 4 }
  0x4b   : > { %s149_s30 = scalar_lea.sflag (!%p735_p0), [#allocation3], %s660_s19  ;;  %s152_s3 = scalar_lea.vmem (!%p735_p0), [#allocation2], %s292_s29 }
  0x51   : > { %466 = dma.done.wait (%p736_p5), %s149_s30, 256  }
  0x52   : > { %468 = vsyncadd (%p736_p5), %s149_s30, 4294967040  ;;  %p737_p2 = scmp.eq.s32.totalorder %s536_s13, 0 }
  0x54   : > { %470 = dma.done.wait (%p737_p2), [#allocation6], 256   ;;  %p738_p11 = pmov %p737_p2 }
  0x55   : > { %s176_s17 = scalar_lea.vmem [#allocation7], %s292_s29  ;;  %s301_s5 = sshll.u32 %s536_s13, 8  ;;  %v177_v0 = vld [vmem:[%s152_s3] sm:$0xff]  ;;  %v178_v2 = vld [vmem:[%s152_s3 + $0x8] sm:$0xff] }
  0x56   : > { %472 = vsyncadd (%p738_p11), [#allocation6], 4294967040  ;;  %s201_s4 = sshll.u32 %s176_s17, 4  ;;  %v181_v1 = vld [vmem:[#allocation5] sm:$0xff]  ;;  %v179_v3 = vmul.f32 11.313708, %v177_v0  ;;  %s678_s22 = scalar_lea.hbm %s724_s2, %s301_s5  ;;  %s673_s4 = int_to_ptr.vmem [resolvable:$true] %s201_s4 }
  0x57   : > { %v180_v4 = vmul.f32 11.313708, %v178_v2  ;;  %v182_v5 = vld [vmem:[#allocation5 + $0x8] sm:$0xff]  ;;  %s188_s13 = scalar_lea.sflag [#allocation4], %s660_s19  ;;  %s421_s23 = scalar_lea.vmem %s673_s4, 256 }
  0x58   : > { %v183_v6 = vadd.f32 %v181_v1, %v179_v3  ;;  %p422_p4 = scmp.ne.s32.totalorder %s673_s4, %s421_s23  ;;  %s497_s28 = smov [#allocation7]  }
  0x59   : > { %v184_v7 = vadd.f32 %v182_v5, %v180_v4  ;;  %s425_s6 = sshll.u32 %s497_s28, 4  ;;  %s426_s6 = int_to_ptr.vmem [resolvable:$false] %s425_s6 }
  0x5a   : > { %185 = vst [vmem:[%s176_s17] sm:$0xff] %v183_v6  ;;  %p423_p6 = pnand %p422_p4, %p609_p12  ;;  %s427_s7 = scalar_lea.vmem %s426_s6, 512 }
  0x5b   : > { %186 = vst [vmem:[%s176_s17 + $0x8] sm:$0xff] %v184_v7  ;;  %p428_p10 = scmp.lt.s32.totalorder %s673_s4, %s426_s6  ;;  %p429_p13 = scmp.lt.s32.totalorder %s427_s7, %s421_s23 }
  0x5c   : > { %p424_p8 = pneg %p423_p6 }
  0x5d   : > { %p430_p3 = por %p429_p13, %p428_p10 }
  0x5f   : > { %p431_p7 = pnand %p430_p3, %p424_p8 }
  0x61   : > { %434 = shalt.err (!%p431_p7)
}
  0x62   : > { %s435_s20 = scalar_lea.hbm %s678_s22, 256  ;;  %s439_s25 = scalar_lea.hbm %s724_s2, 512 }
  0x63   : > { %p436_p9 = scmp.ne.s32.totalorder %s678_s22, %s435_s20  ;;  %p440_p5 = scmp.lt.u32.totalorder %s678_s22, %s724_s2 }
  0x64   : > { %p441_p2 = scmp.lt.u32.totalorder %s439_s25, %s435_s20  ;;  %p443_p4 = scmp.lt.u32.totalorder %s435_s20, %s678_s22 }
  0x65   : > { %p437_p1 = pnand %p436_p9, %p609_p12 }
  0x66   : > { %p442_p11 = por %p441_p2, %p440_p5 }
  0x67   : > { %p438_p0 = pneg %p437_p1 }
  0x68   : > { %p444_p6 = por %p443_p4, %p442_p11 }
  0x6a   : > { %p445_p8 = pnand %p444_p6, %p438_p0 }
  0x6c   : > { %448 = shalt.err (!%p445_p8)
}
  0x6d   : > { %s498_s30 = smov 128   ;;  %s499_s3 = smov 8  }
  0x6e   : > { %308 = dma.vmem_to_hbm [thread:$0]  (%p609_p12), %s673_s4, 256, %s678_s22, %s188_s13, %s498_s30, %s498_s30, %s499_s3  }
  0x6f PF: > { %s216_s17 = sand.u32 1, %s479_s9   ;;  %p739_p10 = scmp.ne.s32.totalorder %s729_s16, 0 }
  0x70   : > { %p740_p13 = scmp.ge.s32.totalorder %s491_s12, 2  ;;  %s217_s5 = scalar_lea.sflag [#allocation4], %s216_s17 }
  0x72   : > { %p319_p3 = pnand %p740_p13, %p739_p10 }
  0x74   : > { %474 = dma.done.wait (!%p319_p3), %s217_s5, 256  }
  0x75   : > { %476 = vsyncadd (!%p319_p3), %s217_s5, 4294967040  ;;  %p16_p7 = scmp.ge.s32.totalorder %s571_s21, 4   ;;  %s741_s9 = smov %s483_s10 }
  0x76   : > { %s742_s10 = smov %s487_s11  ;;  %s743_s11 = smov %s605_s8 }
  0x77   : > { %s744_s12 = smov %s571_s21  ;;  %18 = sbr.rel (!%p16_p7) target bundleno = 6 (0x6), region = 77 }
  0x7e   :  { %222 = vsyncpa [#allocation3], 1 }
  0x7f   :  { %224 = vsyncpa [#allocation3 + $0x1], 1 }
  0x80   :  { %225 = vsyncpa [#allocation6], 1 }
  0x81   :  { %226 = vsyncpa [#allocation4], 1 }
  0x82   :  { %228 = vsyncpa [#allocation4 + $0x1], 1 }

</bundles_post_ra>
